<compile_context>
chip_gen: v6e
topology: v6e:2x2x1
jax: 0.10.0
libtpu: 0.0.40
codegen_flags: <defaults>
</compile_context>

<pallas_src>
import functools
import math

import jax
import jax.numpy as jnp
from jax.experimental import pallas as pl
from jax.experimental.pallas import tpu as pltpu


def _round_up(x, mult):
    return ((x + mult - 1) // mult) * mult


def _normalize_columns(weight):
    """f32 column-L2-normalized weight (== module's l2_norm(weight, axis=0))."""
    w32 = weight.astype(jnp.float32)
    norm = jnp.sqrt(jnp.sum(w32 * w32, axis=0, keepdims=True))
    return w32 / jnp.maximum(norm, 1e-12)


def _arcface_kernel(emb_ref, w_ref, lab_ref, out_ref,
                    *, s, cos_m, sin_m, mm, threshold, tn):
    # grid = (class_tiles, batch_tiles): class-tile index for the label scatter.
    ci = pl.program_id(0)

    # cos(theta) = E @ W_norm ; weight is pre-normalized + pre-cast outside.
    # bf16 (or f32) operands, f32 accumulation on the MXU.
    cos_theta = jnp.dot(emb_ref[...], w_ref[...],
                        preferred_element_type=jnp.float32)
    cos_theta = jnp.clip(cos_theta, -1.0, 1.0)

    # ArcFace margin math (f32, VPU + EUP sqrt), fused in the same grid step.
    sin_theta = jnp.sqrt(jnp.maximum(1.0 - cos_theta * cos_theta, 0.0))
    cos_theta_m = cos_theta * cos_m - sin_theta * sin_m
    keep_val = cos_theta - mm
    cos_theta_m = jnp.where((cos_theta - threshold) <= 0.0, keep_val,
                            cos_theta_m)

    # Row-wise scatter: only column label[i] of row i takes the margin value.
    # (1, tn) lane iota broadcast against (tm, 1) labels -> (tm, tn) mask.
    col_ids = ci * tn + jax.lax.broadcasted_iota(jnp.int32, (1, tn), 1)
    is_label = col_ids == lab_ref[...]
    out = jnp.where(is_label, cos_theta_m, cos_theta)
    out_ref[...] = (out * s).astype(out_ref.dtype)


def arcface_forward(embeddings, weight, labels, *, s=32.0, m=0.5,
                    tm=None, tn=None, matmul_dtype=jnp.bfloat16,
                    out_dtype=jnp.float32):
    """Pallas ArcFace forward: returns (B, C) logits (f32 by default)."""
    B, E = embeddings.shape
    E2, C = weight.shape
    assert E == E2, "embedding size mismatch"

    compute_dtype = jnp.dtype(matmul_dtype)
    out_dtype = jnp.dtype(out_dtype)

    # One-time prepass: the bf16 cast already requires a full weight pass, so
    # the column normalization is folded into it for free.  No padded copies.
    w_norm = _normalize_columns(weight).astype(compute_dtype)
    emb = embeddings.astype(compute_dtype)
    lab = labels.astype(jnp.int32).reshape(B, 1)

    in_bpe = compute_dtype.itemsize
    out_bpe = out_dtype.itemsize

    # Big tiles: lane-dense output stores, few grid steps, big weight DMAs.
    if tm is None:
        tm = min(_round_up(B, 8), 512)
    if tn is None:
        tn = min(_round_up(C, 128), 2048)

    def block_bytes(tm_, tn_):
        return (tm_ * E + E * tn_) * in_bpe + tm_ * 4 + tm_ * tn_ * out_bpe

    # Keep the double-buffered working set comfortably inside v7x's 64 MiB.
    budget = 36 << 20
    while 2 * block_bytes(tm, tn) > budget:
        if tn > 128:
            tn = max(128, _round_up(tn // 2, 128))
        elif tm > 8:
            tm = max(8, _round_up(tm // 2, 8))
        else:
            break

    # Class axis OUTER (parallel / megacore-split), batch axis inner: the
    # weight block index is constant across consecutive inner steps, so each
    # weight tile is DMA'd from HBM exactly once.
    grid = (pl.cdiv(C, tn), pl.cdiv(B, tm))

    vmem_limit = int(min(max(2 * block_bytes(tm, tn) + (8 << 20), 32 << 20),
                         48 << 20))

    kernel = functools.partial(
        _arcface_kernel, s=float(s), cos_m=math.cos(m), sin_m=math.sin(m),
        mm=math.sin(m) * m, threshold=math.cos(math.pi - m), tn=tn)

    return pl.pallas_call(
        kernel,
        out_shape=jax.ShapeDtypeStruct((B, C), out_dtype),
        grid=grid,
        in_specs=[
            pl.BlockSpec((tm, E), lambda ci, bi: (bi, 0)),   # embeddings
            pl.BlockSpec((E, tn), lambda ci, bi: (0, ci)),   # normalized weight
            pl.BlockSpec((tm, 1), lambda ci, bi: (bi, 0)),   # labels
        ],
        out_specs=pl.BlockSpec((tm, tn), lambda ci, bi: (bi, ci)),
        compiler_params=pltpu.CompilerParams(
            dimension_semantics=("parallel", "arbitrary"),
            vmem_limit_bytes=vmem_limit),
    )(emb, w_norm, lab)


def arcface_reference(embeddings, weight, labels, *, s=32.0, m=0.5,
                      matmul_dtype=None):
    """Pure-JAX reference mirroring the PyTorch module.

    If matmul_dtype is given, the matmul operands are quantized the same way
    the kernel streams them (prepass-normalized weight, cast, dequant), so the
    comparison isolates the fused kernel logic from the quantization choice.
    """
    cos_m, sin_m = math.cos(m), math.sin(m)
    mm = sin_m * m
    threshold = math.cos(math.pi - m)

    kernel_norm = _normalize_columns(weight)
    emb = embeddings.astype(jnp.float32)
    if matmul_dtype is not None:
        kernel_norm = kernel_norm.astype(matmul_dtype).astype(jnp.float32)
        emb = emb.astype(matmul_dtype).astype(jnp.float32)

    cos_theta = jnp.dot(emb, kernel_norm, precision=jax.lax.Precision.HIGHEST)
    cos_theta = jnp.clip(cos_theta, -1.0, 1.0)
    sin_theta = jnp.sqrt(jnp.maximum(1.0 - cos_theta ** 2, 0.0))
    cos_theta_m = cos_theta * cos_m - sin_theta * sin_m
    keep_val = cos_theta - mm
    cos_theta_m = jnp.where((cos_theta - threshold) <= 0.0, keep_val,
                            cos_theta_m)
    one_hot = jax.nn.one_hot(labels, cos_theta.shape[1], dtype=jnp.bool_)
    return jnp.where(one_hot, cos_theta_m, cos_theta) * s


if __name__ == "__main__":
    # Small synthetic shapes consistent with the module (embedding_size x classnum).
    batch = 8
    embedding_size = 32
    classnum = 256
    s, m = 32.0, 0.5

    key = jax.random.PRNGKey(0)
    k_emb, k_w, k_lab = jax.random.split(key, 3)

    embeddings = jax.random.normal(k_emb, (batch, embedding_size), jnp.float32)
    # Mimics Parameter(...).uniform_(-1,1).renorm_(2,1,1e-5).mul_(1e5):
    # columns rescaled to norm <= 1 (the forward re-normalizes anyway).
    weight = jax.random.uniform(k_w, (embedding_size, classnum), jnp.float32,
                                minval=-1.0, maxval=1.0)
    weight = weight / jnp.maximum(
        jnp.linalg.norm(weight, axis=0, keepdims=True), 1.0)
    labels = jax.random.randint(k_lab, (batch,), 0, classnum, jnp.int32)

    # Default (bf16-streamed) path.
    out = jax.block_until_ready(
        arcface_forward(embeddings, weight, labels, s=s, m=m))
    assert out.shape == (batch, classnum)

    # Reference with identically quantized matmul operands (isolates kernel
    # logic from the bf16 streaming choice).
    ref_q = arcface_reference(embeddings, weight, labels, s=s, m=m,
                              matmul_dtype=jnp.bfloat16)
    assert jnp.allclose(out, ref_q, atol=5e-2, rtol=1e-2), \
        "mismatch vs bf16-quantized reference"

    # Forced multi-tile run exercises the class-tile offset / boundary logic;
    # same inputs + same reduction => results must match the default tiling.
    out_tiled = jax.block_until_ready(
        arcface_forward(embeddings, weight, labels, s=s, m=m, tm=8, tn=128))
    assert jnp.allclose(out_tiled, out, atol=1e-3, rtol=1e-3), \
        "tiling-dependent result mismatch"

    print("KERNEL_OK")
</pallas_src>

<mosaic_0001>
module attributes {stable_mosaic.version = 11 : i64} {
  func.func @_arcface_kernel(%arg0: i32, %arg1: i32, %arg2: memref<8x32xbf16, #tpu.memory_space<vmem>>, %arg3: memref<32x256xbf16, #tpu.memory_space<vmem>>, %arg4: memref<8x1xi32, #tpu.memory_space<vmem>>, %arg5: memref<8x256xf32, #tpu.memory_space<vmem>>) attributes {dimension_semantics = [#tpu.dimension_semantics<parallel>, #tpu.dimension_semantics<arbitrary>], iteration_bounds = array<i64: 1, 1>, scalar_prefetch = 0 : i64, scratch_operands = 0 : i64, tpu.core_type = #tpu.core_type<tc>, window_params = [{transform_indices = @transform_0, window_bounds = array<i64: 8, 32>}, {transform_indices = @transform_1, window_bounds = array<i64: 32, 256>}, {transform_indices = @transform_2, window_bounds = array<i64: 8, 1>}, {transform_indices = @transform_3, window_bounds = array<i64: 8, 256>}]} {
    %c0 = arith.constant 0 : index
    %c0_0 = arith.constant 0 : index
    %0 = vector.load %arg2[%c0, %c0_0] : memref<8x32xbf16, #tpu.memory_space<vmem>>, vector<8x32xbf16>
    %c0_1 = arith.constant 0 : index
    %c0_2 = arith.constant 0 : index
    %1 = vector.load %arg3[%c0_1, %c0_2] : memref<32x256xbf16, #tpu.memory_space<vmem>>, vector<32x256xbf16>
    %cst = arith.constant dense<0.000000e+00> : vector<8x256xf32>
    %2 = tpu.matmul %0, %1, %cst {dimension_numbers = #tpu.dot_dimension_numbers<[1], [0], [0], [1], [0, 0, 1, 1], [], []>} : vector<8x32xbf16>, vector<32x256xbf16>, vector<8x256xf32> -> vector<8x256xf32>
    %cst_3 = arith.constant -1.000000e+00 : f32
    %cst_4 = arith.constant 1.000000e+00 : f32
    %3 = vector.broadcast %cst_3 : f32 to vector<8x256xf32>
    %4 = arith.maximumf %3, %2 : vector<8x256xf32>
    %5 = vector.broadcast %cst_4 : f32 to vector<8x256xf32>
    %6 = arith.minimumf %5, %4 : vector<8x256xf32>
    %7 = arith.mulf %6, %6 : vector<8x256xf32>
    %cst_5 = arith.constant 1.000000e+00 : f32
    %8 = vector.broadcast %cst_5 : f32 to vector<8x256xf32>
    %9 = arith.subf %8, %7 : vector<8x256xf32>
    %cst_6 = arith.constant 0.000000e+00 : f32
    %10 = vector.broadcast %cst_6 : f32 to vector<8x256xf32>
    %11 = arith.maximumf %9, %10 : vector<8x256xf32>
    %12 = math.sqrt %11 : vector<8x256xf32>
    %cst_7 = arith.constant 0.87758255 : f32
    %13 = vector.broadcast %cst_7 : f32 to vector<8x256xf32>
    %14 = arith.mulf %6, %13 : vector<8x256xf32>
    %cst_8 = arith.constant 0.47942555 : f32
    %15 = vector.broadcast %cst_8 : f32 to vector<8x256xf32>
    %16 = arith.mulf %12, %15 : vector<8x256xf32>
    %17 = arith.subf %14, %16 : vector<8x256xf32>
    %cst_9 = arith.constant 0.239712775 : f32
    %18 = vector.broadcast %cst_9 : f32 to vector<8x256xf32>
    %19 = arith.subf %6, %18 : vector<8x256xf32>
    %cst_10 = arith.constant -0.87758255 : f32
    %20 = vector.broadcast %cst_10 : f32 to vector<8x256xf32>
    %21 = arith.subf %6, %20 : vector<8x256xf32>
    %cst_11 = arith.constant 0.000000e+00 : f32
    %22 = vector.broadcast %cst_11 : f32 to vector<8x256xf32>
    %23 = arith.cmpf ole, %21, %22 : vector<8x256xf32>
    %24 = arith.select %23, %19, %17 : vector<8x256xi1>, vector<8x256xf32>
    %c256_i32 = arith.constant 256 : i32
    %25 = arith.muli %arg0, %c256_i32 : i32
    %26 = tpu.iota {dimensions = array<i32: 1>} : vector<1x256xi32>
    %27 = vector.broadcast %25 : i32 to vector<1x256xi32>
    %28 = arith.addi %27, %26 : vector<1x256xi32>
    %c0_12 = arith.constant 0 : index
    %c0_13 = arith.constant 0 : index
    %29 = vector.load %arg4[%c0_12, %c0_13] : memref<8x1xi32, #tpu.memory_space<vmem>>, vector<8x1xi32>
    %30 = vector.broadcast %28 : vector<1x256xi32> to vector<8x256xi32>
    %31 = vector.broadcast %29 : vector<8x1xi32> to vector<8x256xi32>
    %32 = arith.cmpi eq, %30, %31 : vector<8x256xi32>
    %33 = arith.select %32, %24, %6 : vector<8x256xi1>, vector<8x256xf32>
    %cst_14 = arith.constant 3.200000e+01 : f32
    %34 = vector.broadcast %cst_14 : f32 to vector<8x256xf32>
    %35 = arith.mulf %33, %34 : vector<8x256xf32>
    %c0_15 = arith.constant 0 : index
    %c0_16 = arith.constant 0 : index
    %36 = vector.load %arg5[%c0_15, %c0_16] : memref<8x256xf32, #tpu.memory_space<vmem>>, vector<8x256xf32>
    tpu.vector_store %arg5[%c0_15, %c0_16], %35 {strides = array<i32>} : memref<8x256xf32, #tpu.memory_space<vmem>>, vector<8x256xf32>,
    return
  }
  func.func @transform_0(%arg0: i32, %arg1: i32) -> (i32, i32) {
    %c0_i32 = arith.constant 0 : i32
    %c0_i32_0 = arith.constant 0 : i32
    return %arg1, %c0_i32 : i32, i32
  }
  func.func @transform_1(%arg0: i32, %arg1: i32) -> (i32, i32) {
    %c0_i32 = arith.constant 0 : i32
    %c0_i32_0 = arith.constant 0 : i32
    return %c0_i32, %arg0 : i32, i32
  }
  func.func @transform_2(%arg0: i32, %arg1: i32) -> (i32, i32) {
    %c0_i32 = arith.constant 0 : i32
    %c0_i32_0 = arith.constant 0 : i32
    return %arg1, %c0_i32 : i32, i32
  }
  func.func @transform_3(%arg0: i32, %arg1: i32) -> (i32, i32) {
    %c0_i32 = arith.constant 0 : i32
    return %arg1, %arg0 : i32, i32
  }
}

</mosaic_0001>

<bundles_post_ra>
// kernel: tpu_custom_call.1
= control target key start
LH: loop header
LB: loop body
LE: loop exit
PB: predicated region body
PF: predicated region fallthrough
CT: control target
= control target key end

     0   :  { %8 = vsyncpa [#allocation3], 0  ;;  %s280_s0 = inlined_call_operand.vmem [shape: bf16[8,32], index: 0, kind: input, shape index: {}]   ;;  %s281_s1 = inlined_call_operand.hbm [shape: bf16[32,256], index: 1, kind: input, shape index: {}]   ;;  %s282_s2 = inlined_call_operand.vmem [shape: s32[8,1], index: 2, kind: input, shape index: {}]   ;;  %s283_s3 = inlined_call_operand.hbm [shape: f32[8,256], index: 3, kind: output, shape index: {}]  }
   0x1   :  { %9 = vsyncpa [#allocation4], 0  ;;  %s243_s12 = smov [#allocation2]  }
   0x2   :  { %s17_s13 = sshll.u32 %s243_s12, 4  ;;  %s18_s13 = int_to_ptr.vmem [resolvable:$true] %s17_s13 }
   0x3   :  { %s207_s14 = scalar_lea.vmem %s18_s13, 512  ;;  %p212_p1 = scmp.lt.s32.totalorder %s18_s13, %s18_s13 }
   0x4   :  { %p208_p0 = scmp.ne.s32.totalorder %s18_s13, %s207_s14  ;;  %p213_p2 = scmp.lt.s32.totalorder %s207_s14, %s207_s14 }
   0x6   :  { %p214_p3 = por %p213_p2, %p212_p1 }
   0x8   :  { %p215_p4 = pnand %p214_p3, %p208_p0 }
   0xa   :  { %218 = shalt.err (!%p215_p4)
}
   0xb   :  { %s244_s15 = smov 128   ;;  %s245_s16 = smov 8  }
   0xc   :  { %23 = dma.hbm_to_vmem [thread:$0]  %s281_s1, 512, %s18_s13, [#allocation3], %s244_s15, %s244_s15, %s245_s16  }
   0xd   :  { %239 = dma.done.wait [#allocation3], 512  }
   0xe   :  { %240 = vsyncadd [#allocation3], 4294966784  ;;  %v246_v0 = vmov 0   ;;  %v189_v1 = vld [vmem:[#allocation2 + $0x14] ss:$8 sps:$4 sm:$0xff]   ;;  %v145_v5 = vld [vmem:[%s282_s2] sm:$0xff]  ;;  %v139_v19 = vlaneseq }
   0xf   :  { %91 = vmatprep.mubr.bf16.mxu0 %v246_v0  ;;  %188 = vset.pattern.permute.xlu0 %v246_v0  ;;  %v191_v2 = vld [vmem:[#allocation2 + $0x10] ss:$8 sps:$4 sm:$0xff]   ;;  %v192_v3 = vld [vmem:[#allocation2 + $0x4] ss:$8 sps:$4 sm:$0xff]   ;;  %v194_v4 = vld [vmem:[#allocation2] ss:$8 sps:$4 sm:$0xff]  }
  0x10   :  { %71 = vmatprep.subr.bf16.mxu0 %v189_v1  ;;  %147 = vperm.xlu0 %188, %v145_v5   ;;  %v30_v6 = vld [vmem:[%s280_s0] sm:$0xf]  ;;  %vm55_vm0 = vcmask 261120   ;;  %v140_v20 = vand.u32 127, %v139_v19  ;;  %s247_s0 = smov [#allocation5]  }
  0x11   :  { %72 = vmatpush1.bf16.msra.mxu0 %v191_v2  ;;  %s163_s2 = sshll.u32 %s247_s0, 4  ;;  %s164_s2 = int_to_ptr.vmem [resolvable:$true] %s163_s2 }
  0x12   :  { %73 = vmatprep.subr.bf16.mxu0 %v192_v3  ;;  %v141_v25 = vadd.s32 128, %v140_v20  ;;  %s219_s22 = scalar_lea.vmem %s164_s2, 256  ;;  %p224_p6 = scmp.lt.s32.totalorder %s164_s2, %s164_s2 }
  0x13   :  { %p220_p5 = scmp.ne.s32.totalorder %s164_s2, %s219_s22  ;;  %p225_p7 = scmp.lt.s32.totalorder %s219_s22, %s219_s22 }
  0x15   :  { %74 = vmatpush1.bf16.msra.mxu0 %v194_v4  ;;  %p226_p8 = por %p225_p7, %p224_p6 }
  0x17   :  { %p227_p9 = pnand %p226_p8, %p220_p5 }
  0x18   :  { %176 = vmatmul.mubr.msk.bf16.vlgmr.msra.gmra.mxu0 %vm55_vm0, %v30_v6 }
  0x8b   :  { %v148_v26 = vpop.permute.xlu0 %147 }
  0x8c   :  { %vm149_vm5 = vcmp.eq.s32.totalorder %v140_v20, %v148_v26  ;;  %vm150_vm7 = vcmp.eq.s32.totalorder %v141_v25, %v148_v26 }
  0xd8   :  { %v93_v7 = vpop.f32.mrf.mxu0 }
  0xd9   :  { %v177_v8 = vclamps-f32 %v93_v7, 1.0 }
  0xda   :  { %v95_v9 = vpop.f32.mrf.mxu0 }
  0xdb   :  { %v104_v10 = vmul.f32 %v177_v8, %v177_v8  ;;  %v178_v11 = vclamps-f32 %v95_v9, 1.0  ;;  %v181_v31 = vadd.f32 0.87758255, %v177_v8  ;;  %v124_v33 = vmul.f32 0.87758255, %v177_v8 }
  0xdc   :  { %v97_v12 = vpop.f32.mrf.mxu0  ;;  %v179_v40 = vadd.f32 -0.23971277, %v177_v8 }
  0xdd   :  { %v106_v13 = vsub.f32 1.0, %v104_v10  ;;  %v105_v14 = vmul.f32 %v178_v11, %v178_v11  ;;  %v182_v36 = vadd.f32 0.87758255, %v178_v11  ;;  %v125_v37 = vmul.f32 0.87758255, %v178_v11 }
  0xde   :  { %v98_v15 = vpop.f32.mrf.mxu0  ;;  %vm134_vm6 = vcmp.le.f32.partialorder %v181_v31, 0.0  ;;  %v180_v42 = vadd.f32 -0.23971277, %v178_v11 }
  0xdf   :  { %v108_v16 = vmax.f32 %v106_v13, 0.0  ;;  %v107_v17 = vsub.f32 1.0, %v105_v14  ;;  %vm135_vm8 = vcmp.le.f32.partialorder %v182_v36, 0.0 }
  0xe1   :  { %195 = vrsqrt.f32 %v108_v16  ;;  %v109_v18 = vmax.f32 %v107_v17, 0.0  ;;  %vm112_vm1 = vcmp.eq.f32.partialorder %v108_v16, inf  ;;  %v115_v24 = vand.u32 2147483648, %v108_v16 }
  0xe2   :  { %vm114_vm2 = vcmp.eq.f32.partialorder %v108_v16, 0.0 }
  0xe3   :  { %197 = vrsqrt.f32 %v109_v18  ;;  %vm119_vm3 = vcmp.eq.f32.partialorder %v109_v18, inf  ;;  %v122_v30 = vand.u32 2147483648, %v109_v18  ;;  %vm121_vm4 = vcmp.eq.f32.partialorder %v109_v18, 0.0 }
  0xee   :  { %v196_v21 = vpop.eup %195 }
  0xef   :  { %v111_v22 = vmul.f32 %v196_v21, %v108_v16 }
  0xf0   :  { %v198_v23 = vpop.eup %197 }
  0xf1   :  { %v113_v27 = vsel %vm112_vm1, %v108_v16, %v111_v22  ;;  %v118_v28 = vmul.f32 %v198_v23, %v109_v18 }
  0xf2   :  { %v116_v29 = vsel %vm114_vm2, %v115_v24, %v113_v27 }
  0xf3   :  { %v120_v32 = vsel %vm119_vm3, %v109_v18, %v118_v28  ;;  %v126_v34 = vmul.f32 0.47942555, %v116_v29 }
  0xf4   :  { %v123_v35 = vsel %vm121_vm4, %v122_v30, %v120_v32 }
  0xf5   :  { %v127_v38 = vmul.f32 0.47942555, %v123_v35  ;;  %v128_v39 = vsub.f32 %v124_v33, %v126_v34 }
  0xf7   :  { %v129_v41 = vsub.f32 %v125_v37, %v127_v38  ;;  %v136_v43 = vsel %vm134_vm6, %v179_v40, %v128_v39 }
  0xf8   :  { %v151_v44 = vsel %vm149_vm5, %v136_v43, %v177_v8 }
  0xf9   :  { %v137_v45 = vsel %vm135_vm8, %v180_v42, %v129_v41  ;;  %v153_v46 = vmul.f32 32.0, %v151_v44 }
  0xfa   :  { %v152_v47 = vsel %vm150_vm7, %v137_v45, %v178_v11 }
  0xfb   :  { %v154_v48 = vmul.f32 32.0, %v152_v47  ;;  %155 = vst [vmem:[#allocation5] sm:$0xff] %v153_v46 }
  0xfd   :  { %156 = vst [vmem:[#allocation5 + $0x8] sm:$0xff] %v154_v48 }
  0xfe   :  { %230 = shalt.err (!%p227_p9)
}
  0xff   :  { %166 = dma.vmem_to_hbm [thread:$0]  %s164_s2, 256, %s283_s3, [#allocation4]  }
 0x100   :  { %241 = dma.done.wait [#allocation4], 256  }
 0x101   :  { %242 = vsyncadd [#allocation4], 4294967040 }
 0x102   :  { %170 = vsyncpa [#allocation3], 1 }
 0x103   :  { %171 = vsyncpa [#allocation4], 1 }

</bundles_post_ra>
